<compile_context>
chip_gen: v7x
topology: tpu7x:2x2x1
jax: 0.10.0
libtpu: 0.0.40
codegen_flags: <defaults>
</compile_context>

<pallas_src>
import jax
import jax.numpy as jnp
from jax import lax
from jax.experimental import pallas as pl
from jax.experimental.pallas import tpu as pltpu

EPS = 1e-5  # nn.LayerNorm default


# --------------------------------------------------------------------------
# Tile-size / VMEM helpers
# --------------------------------------------------------------------------
def _sublane_multiple(dtype) -> int:
    # 8 rows for 4-byte dtypes, 16 for 2-byte, 32 for 1-byte (vreg packing).
    itemsize = jnp.dtype(dtype).itemsize
    return max(8, 32 // max(itemsize, 1))


def _vmem_limit_bytes() -> int:
    try:
        cap = int(pltpu.get_tpu_info().vmem_capacity_bytes)
    except Exception:
        cap = 64 * 1024 * 1024  # conservative fallback (v7x per-TC size)
    # Leave headroom for compiler-internal scratch; raise the scoped limit
    # above the 16/32 MiB defaults so big tiles compile.
    return max(32 * 1024 * 1024, min(cap * 3 // 4, cap - (8 << 20)))


def _round_up(v: int, m: int) -> int:
    return -(-int(v) // int(m)) * int(m)


def _choose_rows_tile(n_rows: int, budget_rows: int, *, align: int, sub: int) -> int:
    """Balanced, aligned, VMEM-budgeted row tile.

    Returns either the full row axis (always a legal block) or a multiple of
    `align` (itself a multiple of the sublane packing `sub`). The tile is
    balanced across grid blocks so the tail block isn't nearly empty.
    """
    n_rows = int(n_rows)
    budget_rows = max(int(budget_rows), sub)
    if budget_rows < align:
        align = sub  # too VMEM-tight for MXU-aligned tiles; fall back
    if n_rows <= align and n_rows <= budget_rows:
        return n_rows  # single block covering the whole (short) row axis
    max_rows = min(budget_rows, n_rows)
    max_rows = max(align, (max_rows // align) * align)
    n_blocks = -(-n_rows // max_rows)
    rows = -(-n_rows // n_blocks)          # balanced across blocks
    rows = _round_up(rows, align)          # keep MXU / sublane alignment
    return min(rows, max_rows)


def _compiler_params(vmem_limit: int, semantics):
    return pltpu.CompilerParams(
        dimension_semantics=semantics,
        vmem_limit_bytes=int(vmem_limit),
    )


# --------------------------------------------------------------------------
# Kernel bodies
# --------------------------------------------------------------------------
def _layernorm_kernel(x_ref, g_ref, b_ref, o_ref):
    # One-pass mean/variance: single sweep of the tile (halves vld traffic and
    # XLU reduction pushes vs. the two-pass form). All math in f32.
    x = x_ref[...].astype(jnp.float32)
    inv_d = 1.0 / x.shape[-1]
    mean = jnp.sum(x, axis=-1, keepdims=True) * inv_d
    ex2 = jnp.sum(x * x, axis=-1, keepdims=True) * inv_d
    var = jnp.maximum(ex2 - mean * mean, 0.0)   # guard tiny negative cancellation
    inv = lax.rsqrt(var + EPS)
    o_ref[...] = ((x - mean) * inv * g_ref[...] + b_ref[...]).astype(o_ref.dtype)


def _make_fused_kernel(has_bias: bool):
    """Fused LayerNorm + (y @ W [+ b]), tiled over the out_dim grid axis.

    Grid = (row_blocks, out_blocks). LayerNorm is computed once per row block
    (when j == 0) into a VMEM scratch in the *weight* dtype and reused for all
    out-column blocks — so a bf16 weight gives a native-rate bf16 MXU matmul.
    """

    def kernel(x_ref, g_ref, b_ref, w_ref, *rest):
        if has_bias:
            wb_ref, o_ref, y_ref = rest
        else:
            o_ref, y_ref = rest

        @pl.when(pl.program_id(1) == 0)
        def _():
            x = x_ref[...].astype(jnp.float32)
            inv_d = 1.0 / x.shape[-1]
            mean = jnp.sum(x, axis=-1, keepdims=True) * inv_d
            ex2 = jnp.sum(x * x, axis=-1, keepdims=True) * inv_d
            var = jnp.maximum(ex2 - mean * mean, 0.0)
            inv = lax.rsqrt(var + EPS)
            y = (x - mean) * inv * g_ref[...] + b_ref[...]
            # Cast DOWN to the weight dtype; never upcast W to f32.
            y_ref[...] = y.astype(y_ref.dtype)

        out = jnp.dot(y_ref[...], w_ref[...], preferred_element_type=jnp.float32)
        if has_bias:
            out = out + wb_ref[...]
        o_ref[...] = out.astype(o_ref.dtype)

    return kernel


# --------------------------------------------------------------------------
# Wrappers
# --------------------------------------------------------------------------
def layer_norm_pallas(x, gamma, beta, *, rows_tile=None):
    """LayerNorm over the last axis of x (any leading shape)."""
    orig_shape = x.shape
    dim = orig_shape[-1]
    x2 = x.reshape(-1, dim)
    n_rows = x2.shape[0]
    itemsize = jnp.dtype(x.dtype).itemsize
    sub = _sublane_multiple(x.dtype)

    vmem_limit = _vmem_limit_bytes()
    usable = (vmem_limit * 3) // 4
    # in+out tiles (double-buffered) + in-kernel f32 temps of the tile.
    bytes_per_row = dim * (4 * itemsize + 4 * 4)
    budget_rows = min(1024, max(sub, usable // max(bytes_per_row, 1)))
    if rows_tile is not None:
        budget_rows = min(budget_rows, int(rows_tile))
    rows_tile = _choose_rows_tile(n_rows, budget_rows, align=sub, sub=sub)

    g2 = gamma.reshape(1, dim).astype(jnp.float32)
    b2 = beta.reshape(1, dim).astype(jnp.float32)

    grid = (pl.cdiv(n_rows, rows_tile),)  # partial last block masked by Pallas
    out = pl.pallas_call(
        _layernorm_kernel,
        out_shape=jax.ShapeDtypeStruct((n_rows, dim), x.dtype),
        grid_spec=pltpu.PrefetchScalarGridSpec(
            num_scalar_prefetch=0,
            grid=grid,
            in_specs=[
                pl.BlockSpec((rows_tile, dim), lambda i: (i, 0)),
                pl.BlockSpec((1, dim), lambda i: (0, 0)),
                pl.BlockSpec((1, dim), lambda i: (0, 0)),
            ],
            out_specs=pl.BlockSpec((rows_tile, dim), lambda i: (i, 0)),
        ),
        compiler_params=_compiler_params(vmem_limit, ("parallel",)),
    )(x2, g2, b2)
    return out.reshape(orig_shape)


def layer_norm_linear_pallas(x, gamma, beta, weight, bias=None, *,
                             rows_tile=None, out_tile=None):
    """Fused LayerNorm + (x_norm @ weight [+ bias]).

    out_dim is tiled with a second grid axis, so large projections stay fused.
    Returns None only in the extreme case where even a single 128-column weight
    tile does not fit VMEM; the caller then falls back to the unfused path.
    """
    orig_shape = x.shape
    dim = orig_shape[-1]
    out_dim = weight.shape[-1]
    x2 = x.reshape(-1, dim)
    n_rows = x2.shape[0]
    x_item = jnp.dtype(x.dtype).itemsize
    w_item = jnp.dtype(weight.dtype).itemsize
    sub = _sublane_multiple(x.dtype)

    vmem_limit = _vmem_limit_bytes()
    usable = (vmem_limit * 3) // 4

    # Even a minimal (dim, 128) weight tile (double-buffered) must fit.
    if 2 * dim * min(out_dim, 128) * w_item > usable // 2:
        return None

    # ---- out_dim tile -----------------------------------------------------
    if out_tile is not None:
        tn = int(out_tile)
        tn = out_dim if tn >= out_dim else max(128, (tn // 128) * 128)
    else:
        # 2x (double-buffered) weight tile capped to ~1/4 of usable VMEM.
        cols_budget = max(1, (usable // 4) // max(2 * dim * w_item, 1))
        if cols_budget >= out_dim or out_dim <= 128:
            tn = out_dim
        else:
            tn = max(128, (cols_budget // 128) * 128)
    if tn < out_dim:
        nb = -(-out_dim // tn)
        tn = min(tn, _round_up(-(-out_dim // nb), 128))  # balance out blocks
    n_out_blocks = -(-out_dim // tn)

    # ---- row tile: MXU-aligned (256 is native on v6e/v7x, a multiple of
    # v5e's 128) and budgeted incl. f32 intermediates + y scratch ------------
    fixed = 2 * dim * tn * w_item + 4 * (2 * dim + 2 * tn) * 4  # W + g/b/wb
    per_row = (dim * x_item * 2        # x tile, double buffered
               + tn * x_item * 2       # out tile, double buffered
               + dim * w_item          # y scratch (single buffer)
               + 4 * dim * 4           # f32 temps of x / y in the body
               + tn * 4)               # f32 matmul accumulator
    budget_rows = min(512, max(sub, (usable - fixed) // max(per_row, 1)))
    if rows_tile is not None:
        budget_rows = min(budget_rows, int(rows_tile))
    rows_tile = _choose_rows_tile(n_rows, budget_rows, align=256, sub=sub)

    g2 = gamma.reshape(1, dim).astype(jnp.float32)
    b2 = beta.reshape(1, dim).astype(jnp.float32)
    has_bias = bias is not None

    in_specs = [
        pl.BlockSpec((rows_tile, dim), lambda i, j: (i, 0)),
        pl.BlockSpec((1, dim), lambda i, j: (0, 0)),
        pl.BlockSpec((1, dim), lambda i, j: (0, 0)),
        pl.BlockSpec((dim, tn), lambda i, j: (0, j)),   # W tile (own dtype)
    ]
    args = [x2, g2, b2, weight]
    if has_bias:
        in_specs.append(pl.BlockSpec((1, tn), lambda i, j: (0, j)))
        args.append(bias.reshape(1, out_dim).astype(jnp.float32))

    grid = (pl.cdiv(n_rows, rows_tile), n_out_blocks)
    out = pl.pallas_call(
        _make_fused_kernel(has_bias),
        out_shape=jax.ShapeDtypeStruct((n_rows, out_dim), x.dtype),
        grid_spec=pltpu.PrefetchScalarGridSpec(
            num_scalar_prefetch=0,
            grid=grid,
            in_specs=in_specs,
            out_specs=pl.BlockSpec((rows_tile, tn), lambda i, j: (i, j)),
            scratch_shapes=[pltpu.VMEM((rows_tile, dim), weight.dtype)],
        ),
        compiler_params=_compiler_params(vmem_limit, ("parallel", "arbitrary")),
    )(*args)
    return out.reshape(orig_shape[:-1] + (out_dim,))


# --------------------------------------------------------------------------
# Modules
# --------------------------------------------------------------------------
class FusedLinear:
    """Linear projection y = x @ W (+ b) that PreNorm knows how to fuse."""

    def __init__(self, weight, bias=None):
        self.weight = weight  # (dim_in, dim_out)
        self.bias = bias

    def __call__(self, x):
        y = jnp.einsum("...d,de->...e", x, self.weight)
        if self.bias is not None:
            y = y + self.bias
        return y


class PreNorm:
    """JAX/Pallas equivalent of the PyTorch PreNorm module (norm_type='ln')."""

    def __init__(self, dim, fn):
        self.dim = dim
        self.fn = fn
        # nn.LayerNorm default init: weight=1, bias=0 (deterministic).
        self.gamma = jnp.ones((dim,), jnp.float32)
        self.beta = jnp.zeros((dim,), jnp.float32)

    def __call__(self, x, *args, **kwargs):
        # Fast path: fuse LN + linear projection into one kernel (saves writing
        # and re-reading the normalized tensor through HBM).
        if isinstance(self.fn, FusedLinear) and not args and not kwargs:
            fused = layer_norm_linear_pallas(
                x, self.gamma, self.beta, self.fn.weight, self.fn.bias)
            if fused is not None:
                return fused
        # General path: standalone LN kernel, then arbitrary fn in plain JAX.
        x = layer_norm_pallas(x, self.gamma, self.beta)
        return self.fn(x, *args, **kwargs)


# --------------------------------------------------------------------------
# Demo / correctness check
# --------------------------------------------------------------------------
def _ln_ref(x, g, b):
    mean = jnp.mean(x, axis=-1, keepdims=True)
    var = jnp.mean((x - mean) ** 2, axis=-1, keepdims=True)
    return (x - mean) / jnp.sqrt(var + EPS) * g + b


if __name__ == "__main__":
    key = jax.random.PRNGKey(0)
    k_x, k_w, k_b, k_x2, k_w2 = jax.random.split(key, 5)

    batch, seq, dim, out_dim = 2, 8, 32, 32
    x = jax.random.normal(k_x, (batch, seq, dim), dtype=jnp.float32)

    # --- Fused path A: PreNorm wrapping a linear projection (f32 W, bias).
    w = jax.random.normal(k_w, (dim, out_dim), dtype=jnp.float32) * 0.02
    b = jax.random.normal(k_b, (out_dim,), dtype=jnp.float32) * 0.02
    prenorm_lin = PreNorm(dim, FusedLinear(w, b))
    out_fused = jax.block_until_ready(prenorm_lin(x))
    ref_fused = jnp.einsum(
        "bsd,de->bse", _ln_ref(x, prenorm_lin.gamma, prenorm_lin.beta), w) + b
    assert jnp.allclose(out_fused, ref_fused, atol=1e-4, rtol=1e-4), \
        "fused PreNorm (f32, bias) mismatch vs reference"

    # --- Fused path B: bf16 weight, no bias, out_dim tiled (forces 2 out
    # blocks) — exercises the cast-to-weight-dtype matmul and the pl.when
    # LN-once / reuse-across-out-blocks logic.
    big_out = 256
    w_bf16 = (jax.random.normal(k_w2, (dim, big_out), dtype=jnp.float32)
              * 0.02).astype(jnp.bfloat16)
    gamma = jnp.ones((dim,), jnp.float32)
    beta = jnp.zeros((dim,), jnp.float32)
    out_b = jax.block_until_ready(
        layer_norm_linear_pallas(x, gamma, beta, w_bf16, None, out_tile=128))
    ref_b = jnp.einsum("bsd,de->bse", _ln_ref(x, gamma, beta),
                       w_bf16.astype(jnp.float32))
    assert jnp.allclose(out_b, ref_b, atol=2e-2, rtol=2e-2), \
        "fused PreNorm (bf16 W, tiled out_dim) mismatch vs reference"

    # --- General path: PreNorm wrapping an arbitrary fn (GELU); ragged row
    # count (3*7 = 21 rows) exercises the no-padding partial-tile handling.
    x_rag = jax.random.normal(k_x2, (3, 7, dim), dtype=jnp.float32)
    prenorm_gen = PreNorm(dim, jax.nn.gelu)
    out_gen = jax.block_until_ready(prenorm_gen(x_rag))
    ref_gen = jax.nn.gelu(_ln_ref(x_rag, prenorm_gen.gamma, prenorm_gen.beta))
    assert jnp.allclose(out_gen, ref_gen, atol=1e-4, rtol=1e-4), \
        "general PreNorm mismatch vs reference"

    print("KERNEL_OK")
</pallas_src>

<mosaic_0001>
module attributes {stable_mosaic.version = 11 : i64} {
  func.func @kernel(%arg0: i32, %arg1: i32, %arg2: memref<16x32xf32, #tpu.memory_space<vmem>>, %arg3: memref<1x32xf32, #tpu.memory_space<vmem>>, %arg4: memref<1x32xf32, #tpu.memory_space<vmem>>, %arg5: memref<32x32xf32, #tpu.memory_space<vmem>>, %arg6: memref<1x32xf32, #tpu.memory_space<vmem>>, %arg7: memref<16x32xf32, #tpu.memory_space<vmem>>, %arg8: memref<16x32xf32, #tpu.memory_space<vmem>>) attributes {dimension_semantics = [#tpu.dimension_semantics<parallel>, #tpu.dimension_semantics<arbitrary>], iteration_bounds = array<i64: 1, 1>, scalar_prefetch = 0 : i64, scratch_operands = 1 : i64, tpu.core_type = #tpu.core_type<tc>, window_params = [{transform_indices = @transform_0, window_bounds = array<i64: 16, 32>}, {pipeline_mode = #tpu.pipeline_mode<synchronous>, transform_indices = @transform_1, window_bounds = array<i64: 1, 32>}, {pipeline_mode = #tpu.pipeline_mode<synchronous>, transform_indices = @transform_2, window_bounds = array<i64: 1, 32>}, {transform_indices = @transform_3, window_bounds = array<i64: 32, 32>}, {transform_indices = @transform_4, window_bounds = array<i64: 1, 32>}, {transform_indices = @transform_5, window_bounds = array<i64: 16, 32>}]} {
    %c0_i32 = arith.constant 0 : i32
    %0 = arith.cmpi eq, %arg1, %c0_i32 : i32
    %1 = arith.extui %0 : i1 to i32
    %c0_i32_0 = arith.constant 0 : i32
    %2 = arith.cmpi ne, %1, %c0_i32_0 : i32
    scf.if %2 {
      %c0_8 = arith.constant 0 : index
      %c0_9 = arith.constant 0 : index
      %10 = vector.load %arg2[%c0_8, %c0_9] : memref<16x32xf32, #tpu.memory_space<vmem>>, vector<16x32xf32>
      %cst_10 = arith.constant dense<0.000000e+00> : vector<16xf32>
      %11 = vector.multi_reduction <add>, %10, %cst_10 [1] : vector<16x32xf32> to vector<16xf32>
      %12 = vector.shape_cast %11 : vector<16xf32> to vector<16x1xf32>
      %cst_11 = arith.constant 3.125000e-02 : f32
      %13 = vector.broadcast %cst_11 : f32 to vector<16x1xf32>
      %14 = arith.mulf %12, %13 : vector<16x1xf32>
      %15 = arith.mulf %10, %10 : vector<16x32xf32>
      %cst_12 = arith.constant dense<0.000000e+00> : vector<16xf32>
      %16 = vector.multi_reduction <add>, %15, %cst_12 [1] : vector<16x32xf32> to vector<16xf32>
      %17 = vector.shape_cast %16 : vector<16xf32> to vector<16x1xf32>
      %cst_13 = arith.constant 3.125000e-02 : f32
      %18 = vector.broadcast %cst_13 : f32 to vector<16x1xf32>
      %19 = arith.mulf %17, %18 : vector<16x1xf32>
      %20 = arith.mulf %14, %14 : vector<16x1xf32>
      %21 = arith.subf %19, %20 : vector<16x1xf32>
      %cst_14 = arith.constant 0.000000e+00 : f32
      %22 = vector.broadcast %cst_14 : f32 to vector<16x1xf32>
      %23 = arith.maximumf %21, %22 : vector<16x1xf32>
      %cst_15 = arith.constant 9.99999974E-6 : f32
      %24 = vector.broadcast %cst_15 : f32 to vector<16x1xf32>
      %25 = arith.addf %23, %24 : vector<16x1xf32>
      %26 = math.rsqrt %25 : vector<16x1xf32>
      %27 = vector.broadcast %14 : vector<16x1xf32> to vector<16x32xf32>
      %28 = arith.subf %10, %27 : vector<16x32xf32>
      %29 = vector.broadcast %26 : vector<16x1xf32> to vector<16x32xf32>
      %30 = arith.mulf %28, %29 : vector<16x32xf32>
      %c0_16 = arith.constant 0 : index
      %c0_17 = arith.constant 0 : index
      %31 = vector.load %arg3[%c0_16, %c0_17] : memref<1x32xf32, #tpu.memory_space<vmem>>, vector<1x32xf32>
      %32 = vector.broadcast %31 : vector<1x32xf32> to vector<16x32xf32>
      %33 = arith.mulf %30, %32 : vector<16x32xf32>
      %c0_18 = arith.constant 0 : index
      %c0_19 = arith.constant 0 : index
      %34 = vector.load %arg4[%c0_18, %c0_19] : memref<1x32xf32, #tpu.memory_space<vmem>>, vector<1x32xf32>
      %35 = vector.broadcast %34 : vector<1x32xf32> to vector<16x32xf32>
      %36 = arith.addf %33, %35 : vector<16x32xf32>
      %c0_20 = arith.constant 0 : index
      %c0_21 = arith.constant 0 : index
      %37 = vector.load %arg8[%c0_20, %c0_21] : memref<16x32xf32, #tpu.memory_space<vmem>>, vector<16x32xf32>
      tpu.vector_store %arg8[%c0_20, %c0_21], %36 {strides = array<i32>} : memref<16x32xf32, #tpu.memory_space<vmem>>, vector<16x32xf32>,
    } else {
    }
    %c0 = arith.constant 0 : index
    %c0_1 = arith.constant 0 : index
    %3 = vector.load %arg8[%c0, %c0_1] : memref<16x32xf32, #tpu.memory_space<vmem>>, vector<16x32xf32>
    %c0_2 = arith.constant 0 : index
    %c0_3 = arith.constant 0 : index
    %4 = vector.load %arg5[%c0_2, %c0_3] : memref<32x32xf32, #tpu.memory_space<vmem>>, vector<32x32xf32>
    %cst = arith.constant dense<0.000000e+00> : vector<16x32xf32>
    %5 = tpu.matmul %3, %4, %cst {dimension_numbers = #tpu.dot_dimension_numbers<[1], [0], [0], [1], [0, 0, 1, 1], [], []>} : vector<16x32xf32>, vector<32x32xf32>, vector<16x32xf32> -> vector<16x32xf32>
    %c0_4 = arith.constant 0 : index
    %c0_5 = arith.constant 0 : index
    %6 = vector.load %arg6[%c0_4, %c0_5] : memref<1x32xf32, #tpu.memory_space<vmem>>, vector<1x32xf32>
    %7 = vector.broadcast %6 : vector<1x32xf32> to vector<16x32xf32>
    %8 = arith.addf %5, %7 : vector<16x32xf32>
    %c0_6 = arith.constant 0 : index
    %c0_7 = arith.constant 0 : index
    %9 = vector.load %arg7[%c0_6, %c0_7] : memref<16x32xf32, #tpu.memory_space<vmem>>, vector<16x32xf32>
    tpu.vector_store %arg7[%c0_6, %c0_7], %8 {strides = array<i32>} : memref<16x32xf32, #tpu.memory_space<vmem>>, vector<16x32xf32>,
    return
  }
  func.func @transform_0(%arg0: i32, %arg1: i32) -> (i32, i32) {
    %c0_i32 = arith.constant 0 : i32
    %c0_i32_0 = arith.constant 0 : i32
    return %arg0, %c0_i32 : i32, i32
  }
  func.func @transform_1(%arg0: i32, %arg1: i32) -> (i32, i32) {
    %c0_i32 = arith.constant 0 : i32
    %c0_i32_0 = arith.constant 0 : i32
    %c0_i32_1 = arith.constant 0 : i32
    return %c0_i32, %c0_i32_0 : i32, i32
  }
  func.func @transform_2(%arg0: i32, %arg1: i32) -> (i32, i32) {
    %c0_i32 = arith.constant 0 : i32
    %c0_i32_0 = arith.constant 0 : i32
    %c0_i32_1 = arith.constant 0 : i32
    return %c0_i32, %c0_i32_0 : i32, i32
  }
  func.func @transform_3(%arg0: i32, %arg1: i32) -> (i32, i32) {
    %c0_i32 = arith.constant 0 : i32
    %c0_i32_0 = arith.constant 0 : i32
    return %c0_i32, %arg1 : i32, i32
  }
  func.func @transform_4(%arg0: i32, %arg1: i32) -> (i32, i32) {
    %c0_i32 = arith.constant 0 : i32
    %c0_i32_0 = arith.constant 0 : i32
    return %c0_i32, %arg1 : i32, i32
  }
  func.func @transform_5(%arg0: i32, %arg1: i32) -> (i32, i32) {
    %c0_i32 = arith.constant 0 : i32
    return %arg0, %arg1 : i32, i32
  }
}

</mosaic_0001>

<bundles_post_ra>
// kernel: tpu_custom_call.1
= control target key start
LH: loop header
LB: loop body
LE: loop exit
PB: predicated region body
PF: predicated region fallthrough
CT: control target
= control target key end

     0   :  { %10 = vsyncpa [#allocation4], 0  ;;  %s433_s0 = inlined_call_operand.hbm [shape: f32[16,32], index: 0, kind: input, shape index: {}]   ;;  %s434_s1 = inlined_call_operand.vmem [shape: f32[1,32], index: 1, kind: input, shape index: {}]   ;;  %s435_s2 = inlined_call_operand.vmem [shape: f32[1,32], index: 2, kind: input, shape index: {}]   ;;  %s436_s3 = inlined_call_operand.hbm [shape: f32[32,32], index: 3, kind: input, shape index: {}]   ;;  %s437_s4 = inlined_call_operand.vmem [shape: f32[1,32], index: 4, kind: input, shape index: {}]   ;;  %s438_s5 = inlined_call_operand.hbm [shape: f32[16,32], index: 5, kind: output, shape index: {}]  }
   0x1   :  { %11 = vsyncpa [#allocation7], 0 }
   0x2   :  { %12 = vsyncpa [#allocation5], 0  ;;  %s334_s18 = smov [#allocation3]   ;;  %s262_s22 = scalar_lea.hbm %s433_s0, 256 }
   0x3   :  { %s18_s19 = sshll.u32 %s334_s18, 4  ;;  %p263_p0 = scmp.ne.s32.totalorder %s433_s0, %s262_s22  ;;  %s19_s19 = int_to_ptr.vmem [resolvable:$true] %s18_s19 }
   0x4   :  { %p266_p1 = scmp.lt.u32.totalorder %s262_s22, %s433_s0 }
   0x6   :  { %p268_p2 = pnand %p266_p1, %p263_p0 }
   0x8   :  { %271 = shalt.err (!%p268_p2)
}
   0x9   :  { %s272_s27 = scalar_lea.vmem %s19_s19, 256  ;;  %p277_p4 = scmp.lt.s32.totalorder %s19_s19, %s19_s19 }
   0xa   :  { %p273_p3 = scmp.ne.s32.totalorder %s19_s19, %s272_s27  ;;  %p278_p5 = scmp.lt.s32.totalorder %s272_s27, %s272_s27 }
   0xc   :  { %p279_p6 = por %p278_p5, %p277_p4 }
   0xe   :  { %p280_p7 = pnand %p279_p6, %p273_p3 }
  0x10   :  { %283 = shalt.err (!%p280_p7)
}
  0x11   :  { %s335_s28 = smov 128   ;;  %s336_s29 = smov 8  }
  0x12   :  { %24 = dma.hbm_to_vmem [thread:$0]  %s433_s0, 256, %s19_s19, [#allocation4], %s335_s28, %s335_s28, %s336_s29  }
  0x13   :  { %s337_s7 = smov [#allocation6]   ;;  %s284_s11 = scalar_lea.hbm %s436_s3, 512 }
  0x14   :  { %s34_s8 = sshll.u32 %s337_s7, 4  ;;  %p285_p8 = scmp.ne.s32.totalorder %s436_s3, %s284_s11  ;;  %s35_s8 = int_to_ptr.vmem [resolvable:$true] %s34_s8 }
  0x15   :  { %p288_p9 = scmp.lt.u32.totalorder %s284_s11, %s436_s3 }
  0x17   :  { %p290_p10 = pnand %p288_p9, %p285_p8 }
  0x19   :  { %293 = shalt.err (!%p290_p10)
}
  0x1a   :  { %s294_s16 = scalar_lea.vmem %s35_s8, 512  ;;  %p299_p12 = scmp.lt.s32.totalorder %s35_s8, %s35_s8 }
  0x1b   :  { %p295_p11 = scmp.ne.s32.totalorder %s35_s8, %s294_s16  ;;  %p300_p13 = scmp.lt.s32.totalorder %s294_s16, %s294_s16 }
  0x1d   :  { %p301_p0 = por %p300_p13, %p299_p12 }
  0x1f   :  { %p302_p1 = pnand %p301_p0, %p295_p11 }
  0x21   :  { %305 = shalt.err (!%p302_p1)
}
  0x22   :  { %40 = dma.hbm_to_vmem [thread:$0]  %s436_s3, 512, %s35_s8, [#allocation7], %s335_s28, %s335_s28, %s336_s29  }
  0x23   :  { %328 = dma.done.wait [#allocation4], 256  }
  0x24   :  { %329 = vsyncadd [#allocation4], 4294967040 }
  0x25   :  { %330 = dma.done.wait [#allocation7], 512  }
  0x26   :  { %331 = vsyncadd [#allocation7], 4294966784  ;;  %vm55_vm0 = vcmask 261120   ;;  %v53_v0 = vld [vmem:[#allocation3] sm:$0xff]  ;;  %v54_v1 = vld [vmem:[#allocation3 + $0x8] sm:$0xff] }
  0x27   :  { %v56_v2 = vsel %vm55_vm0, %v53_v0, 0.0  ;;  %v64_v3 = vmul.f32 %v53_v0, %v53_v0  ;;  %v65_v4 = vmul.f32 %v54_v1, %v54_v1  ;;  %v59_v6 = vsel %vm55_vm0, %v54_v1, 0.0  ;;  %v110_v8 = vld [vmem:[#allocation6] sm:$0xff]  ;;  %v111_v9 = vld [vmem:[#allocation6 + $0x8] sm:$0xff]  ;;  %v112_v11 = vld [vmem:[#allocation6 + $0x10] sm:$0xff] }
  0x28   :  { %57 = vadd.xlane.f32.xlu0 %v56_v2  ;;  %v245_v10 = vpack.c.bf16 %v111_v9, %v110_v8  ;;  %v113_v12 = vld [vmem:[#allocation6 + $0x18] sm:$0xff]  ;;  %v223_v32 = vld [vmem:[%s434_s1] ss:$0 sm:$0xff] }
  0x29   :  { %v66_v5 = vsel %vm55_vm0, %v64_v3, 0.0  ;;  %v69_v7 = vsel %vm55_vm0, %v65_v4, 0.0  ;;  %v249_v13 = vpack.c.bf16 %v113_v12, %v112_v11  ;;  %v224_v34 = vld [vmem:[%s435_s2] ss:$0 sm:$0xff]  ;;  %s338_s2 = smov [#allocation8]  }
  0x2a   :  { %67 = vadd.xlane.f32.xlu1 %v66_v5  ;;  %246 = vmatprep.subr.bf16.mxu0 %v245_v10  ;;  %v225_v44 = vld [vmem:[%s437_s4] ss:$0 sm:$0xff]  ;;  %s210_s22 = sshll.u32 %s338_s2, 4  ;;  %s211_s22 = int_to_ptr.vmem [resolvable:$true] %s210_s22 }
  0x2b   :  { %248 = vmatpush3.bf16.msra.mxu0 %v245_v10  ;;  %s306_s23 = scalar_lea.vmem %s211_s22, 256  ;;  %p311_p3 = scmp.lt.s32.totalorder %s211_s22, %s211_s22 }
  0x2c   :  { %60 = vadd.xlane.f32.xlu0 %v59_v6  ;;  %250 = vmatprep.subr.bf16.mxu0 %v249_v13  ;;  %p307_p2 = scmp.ne.s32.totalorder %s211_s22, %s306_s23  ;;  %p312_p4 = scmp.lt.s32.totalorder %s306_s23, %s306_s23 }
  0x2e   :  { %70 = vadd.xlane.f32.xlu1 %v69_v7  ;;  %p313_p5 = por %p312_p4, %p311_p3 }
  0x2f   :  { %252 = vmatpush3.bf16.msra.mxu0 %v249_v13 }
  0x30   :  { %p314_p6 = pnand %p313_p5, %p307_p2 }
  0xb5   :  { %v58_v14 = vpop.xlane.xlu0 %57 }
  0xb6   :  { %v62_v15 = vmul.f32 0.03125, %v58_v14 }
  0xb7   :  { %v68_v16 = vpop.xlane.xlu1 %67 }
  0xb8   :  { %v74_v17 = vmul.f32 %v62_v15, %v62_v15  ;;  %v72_v18 = vmul.f32 0.03125, %v68_v16  ;;  %v84_v30 = vsub.f32 %v53_v0, %v62_v15 }
  0xb9   :  { %v61_v19 = vpop.xlane.xlu0 %60 }
  0xba   :  { %v76_v20 = vsub.f32 %v72_v18, %v74_v17  ;;  %v63_v21 = vmul.f32 0.03125, %v61_v19 }
  0xbb   :  { %v71_v22 = vpop.xlane.xlu1 %70 }
  0xbc   :  { %v78_v23 = vmax.f32 %v76_v20, 0.0  ;;  %v75_v24 = vmul.f32 %v63_v21, %v63_v21  ;;  %v73_v25 = vmul.f32 0.03125, %v71_v22  ;;  %v85_v36 = vsub.f32 %v54_v1, %v63_v21 }
  0xbe   :  { %v80_v26 = vadd.f32 1e-05, %v78_v23  ;;  %v77_v27 = vsub.f32 %v73_v25, %v75_v24 }
  0xc0   :  { %258 = vrsqrt.f32 %v80_v26  ;;  %v79_v28 = vmax.f32 %v77_v27, 0.0 }
  0xc2   :  { %v81_v29 = vadd.f32 1e-05, %v79_v28 }
  0xc4   :  { %260 = vrsqrt.f32 %v81_v29 }
  0xca   :  { %v259_v31 = vpop.eup %258 }
  0xcb   :  { %v86_v33 = vmul.f32 %v259_v31, %v84_v30 }
  0xcd   :  { %v95_v35 = vmul.f32 %v223_v32, %v86_v33 }
  0xce   :  { %v261_v37 = vpop.eup %260 }
  0xcf   :  { %v104_v38 = vadd.f32 %v224_v34, %v95_v35  ;;  %v87_v39 = vmul.f32 %v261_v37, %v85_v36 }
  0xd1   :  { %106 = vst.msk [vmem:[#allocation2] sm:$0xff] %vm55_vm0, %v104_v38  ;;  %v96_v40 = vmul.f32 %v223_v32, %v87_v39 }
  0xd3   :  { %v105_v41 = vadd.f32 %v224_v34, %v96_v40 }
  0xd5   :  { %107 = vst.msk [vmem:[#allocation2 + $0x8] sm:$0xff] %vm55_vm0, %v105_v41 }
  0xd8   :  { %v108_v42 = vld [vmem:[#allocation2] sm:$0xff] }
  0xd9   :  { %242 = vmatprep.mubr.msk.f32.mxu0 %vm55_vm0, %v108_v42 }
  0xdc   :  { %v109_v43 = vld [vmem:[#allocation2 + $0x8] sm:$0xff] }
  0xdd   :  { %243 = vmatmul.mubr.msk.f32.vlgmr.msra.gmra.mrb[0].mxu0 %vm55_vm0, %v109_v43 }
 0x1b0   :  { %v244_v45 = vpop.f32.mrb[0].mxu0 }
 0x1b1   :  { %v200_v46 = vadd.f32 %v244_v45, %v225_v44  ;;  %v194_v47 = vpop.f32.mrb[1].mxu0 }
 0x1b2   :  { %v195_v48 = vadd.f32 %v225_v44, %v194_v47 }
 0x1b3   :  { %204 = vst.msk [vmem:[#allocation8 + $0x8] sm:$0xff] %vm55_vm0, %v200_v46 }
 0x1b4   :  { %203 = vst.msk [vmem:[#allocation8] sm:$0xff] %vm55_vm0, %v195_v48 }
 0x1b5   :  { %317 = shalt.err (!%p314_p6)
}
 0x1b6   :  { %s318_s25 = scalar_lea.hbm %s438_s5, 256 }
 0x1b7   :  { %p319_p7 = scmp.ne.s32.totalorder %s438_s5, %s318_s25  ;;  %p322_p8 = scmp.lt.u32.totalorder %s318_s25, %s438_s5 }
 0x1b9   :  { %p324_p9 = pnand %p322_p8, %p319_p7 }
 0x1bb   :  { %327 = shalt.err (!%p324_p9)
}
 0x1bc   :  { %216 = dma.vmem_to_hbm [thread:$0]  %s211_s22, 256, %s438_s5, [#allocation5], %s335_s28, %s335_s28, %s336_s29  }
 0x1bd   :  { %332 = dma.done.wait [#allocation5], 256  }
 0x1be   :  { %333 = vsyncadd [#allocation5], 4294967040 }
 0x1bf   :  { %220 = vsyncpa [#allocation4], 1 }
 0x1c0   :  { %221 = vsyncpa [#allocation7], 1 }
 0x1c1   :  { %222 = vsyncpa [#allocation5], 1 }

</bundles_post_ra>
